<compile_context>
chip_gen: v7x
topology: tpu7x:2x2x1
jax: 0.10.0
libtpu: 0.0.40
codegen_flags: <defaults>
</compile_context>

<pallas_src>
import jax
import jax.numpy as jnp
from jax.experimental import pallas as pl
from jax.experimental.pallas import tpu as pltpu

LANE = 128
_SMALL_FALLBACK_BYTES = 512 * 1024  # below this, plain XLA add is already optimal


def _add_kernel(a_ref, b_ref, o_ref):
    # Elementwise hot path: whole VMEM tile add on the VPU.
    o_ref[...] = a_ref[...] + b_ref[...]


def _chip_config():
    """Return (block_bytes_per_input, vmem_limit_bytes_or_None, force_two_steps)."""
    kind = ""
    try:
        kind = jax.devices()[0].device_kind.lower()
    except Exception:
        pass
    if "v7" in kind or "tpu7" in kind or "7x" in kind:
        # v7x: ~3.2 TB/s HBM per TC -> bigger blocks amortize the per-step tax;
        # 7 MiB x 3 arrays x 2 buffers = 42 MiB needs an explicit scoped-VMEM
        # bump (32 MiB default, 64 MiB physical).  2 TCs -> force grid >= 2.
        return 7 * 1024 * 1024, 48 << 20, True
    if "v6" in kind:
        # v6e: 4 MiB x 3 x 2 = 24 MiB fits the 32 MiB default scoped VMEM.
        return 4 * 1024 * 1024, None, False
    # v5e / unknown chip: 2 MiB x 3 x 2 = 12 MiB fits the 16 MiB default.
    return 2 * 1024 * 1024, None, False


def _bulk_add_2d(a2d, b2d, rows, itemsize, dtype):
    """Tiled elementwise add of two (rows, 128) lane-dense slabs."""
    block_bytes, vmem_limit, force_split = _chip_config()

    # Packed-sublane count: 8 for 32-bit, 16 for bf16, 32 for int8.
    sublane = 8 * max(1, 4 // itemsize)

    # Large per-chip row tile, rounded to the sublane multiple; clamp for small
    # inputs so we don't allocate an oversized VMEM buffer for a tiny problem.
    target_rows = max(sublane, block_bytes // (LANE * itemsize))
    target_rows = (target_rows // sublane) * sublane
    tile_rows = min(target_rows, pl.cdiv(rows, sublane) * sublane)

    if force_split and rows * LANE * itemsize >= (2 << 20):
        # Ensure >= 2 grid steps so dimension_semantics=("parallel",) shards
        # the row grid across both v7x TensorCores even when the whole input
        # would otherwise fit in a single block.
        half_rows = pl.cdiv(pl.cdiv(rows, 2), sublane) * sublane
        tile_rows = min(tile_rows, half_rows)

    grid = (pl.cdiv(rows, tile_rows),)  # partial last block is masked by Pallas

    compiler_kwargs = dict(dimension_semantics=("parallel",))
    if vmem_limit is not None:
        compiler_kwargs["vmem_limit_bytes"] = vmem_limit

    n_elems = rows * LANE
    return pl.pallas_call(
        _add_kernel,
        out_shape=jax.ShapeDtypeStruct((rows, LANE), dtype),
        grid=grid,
        in_specs=[
            pl.BlockSpec((tile_rows, LANE), lambda i: (i, 0)),
            pl.BlockSpec((tile_rows, LANE), lambda i: (i, 0)),
        ],
        out_specs=pl.BlockSpec((tile_rows, LANE), lambda i: (i, 0)),
        compiler_params=pltpu.CompilerParams(**compiler_kwargs),
        cost_estimate=pl.CostEstimate(
            flops=n_elems, transcendentals=0, bytes_accessed=3 * n_elems * itemsize
        ),
    )(a2d, b2d)


def pallas_add(g1: jax.Array, g2: jax.Array, *,
               min_pallas_bytes: int = _SMALL_FALLBACK_BYTES) -> jax.Array:
    assert g1.shape == g2.shape, "add_batch on tensors requires identical shapes"
    assert g1.dtype == g2.dtype
    orig_shape = g1.shape
    dtype = g1.dtype
    n = g1.size
    itemsize = jnp.dtype(dtype).itemsize

    # Small-input fallback: pallas_call dispatch + pipeline prologue dominate
    # below a few hundred KiB; XLA's fused elementwise add is already at the
    # HBM roofline there.
    if n == 0 or n * itemsize < min_pallas_bytes:
        return g1 + g2

    rows = pl.cdiv(n, LANE)
    padded = rows * LANE
    need_pad = padded != n

    a_flat = jnp.ravel(g1)
    b_flat = jnp.ravel(g2)
    if need_pad:
        # TODO(synk): the sub-128 ragged tail still costs a pad + final slice
        # (extra HBM passes on unaligned sizes); a ragged 1-D last block would
        # remove it but is left out here for lowering robustness.  Aligned
        # sizes (the common case) take zero extra passes.
        a_flat = jnp.pad(a_flat, (0, padded - n))
        b_flat = jnp.pad(b_flat, (0, padded - n))

    out2d = _bulk_add_2d(
        a_flat.reshape(rows, LANE), b_flat.reshape(rows, LANE), rows, itemsize, dtype
    )

    if need_pad:
        return out2d.reshape(-1)[:n].reshape(orig_shape)
    return out2d.reshape(orig_shape)


if __name__ == "__main__":
    key = jax.random.PRNGKey(0)
    k1, k2, k3, k4, k5, k6 = jax.random.split(key, 6)

    # Small NCHW tensors (typical Add usage).  Force the Pallas path so the
    # kernel itself is exercised (the default small-input fallback would route
    # these 8 KiB tensors straight to XLA's add).
    x = jax.random.normal(k1, (2, 4, 16, 16), dtype=jnp.float32)
    y = jax.random.normal(k2, (2, 4, 16, 16), dtype=jnp.float32)
    out = pallas_add(x, y, min_pallas_bytes=0)
    jax.block_until_ready(out)
    assert out.shape == x.shape and out.dtype == x.dtype
    assert jnp.allclose(out, x + y, atol=1e-6), "mismatch vs reference"

    # Non-multiple-of-128 size: exercises the masked/padded tail path.
    xo = jax.random.normal(k3, (3, 5, 7), dtype=jnp.float32)
    yo = jax.random.normal(k4, (3, 5, 7), dtype=jnp.float32)
    out_o = pallas_add(xo, yo, min_pallas_bytes=0)
    jax.block_until_ready(out_o)
    assert jnp.allclose(out_o, xo + yo, atol=1e-6), "mismatch vs reference (odd shape)"

    # Moderately sized input (3 MiB) takes the default path: multi-step row
    # grid (sharded across both TensorCores on v7x), no fallback.
    xl = jax.random.normal(k5, (512, 1536), dtype=jnp.float32)
    yl = jax.random.normal(k6, (512, 1536), dtype=jnp.float32)
    out_l = pallas_add(xl, yl)
    jax.block_until_ready(out_l)
    assert jnp.allclose(out_l, xl + yl, atol=1e-6), "mismatch vs reference (large)"

    # Default-threshold small call: exercises the XLA fallback branch too.
    out_fb = pallas_add(x, y)
    jax.block_until_ready(out_fb)
    assert jnp.allclose(out_fb, x + y, atol=1e-6), "mismatch vs reference (fallback)"

    print("KERNEL_OK")
</pallas_src>

<mosaic_0001>
module attributes {stable_mosaic.version = 11 : i64} {
  func.func @_add_kernel(%arg0: i32, %arg1: memref<16x128xf32, #tpu.memory_space<vmem>>, %arg2: memref<16x128xf32, #tpu.memory_space<vmem>>, %arg3: memref<16x128xf32, #tpu.memory_space<vmem>>) attributes {dimension_semantics = [#tpu.dimension_semantics<parallel>], iteration_bounds = array<i64: 1>, scalar_prefetch = 0 : i64, scratch_operands = 0 : i64, tpu.core_type = #tpu.core_type<tc>, window_params = [{transform_indices = @transform_0, window_bounds = array<i64: 16, 128>}, {transform_indices = @transform_1, window_bounds = array<i64: 16, 128>}, {transform_indices = @transform_2, window_bounds = array<i64: 16, 128>}]} {
    %c0 = arith.constant 0 : index
    %c0_0 = arith.constant 0 : index
    %0 = vector.load %arg1[%c0, %c0_0] : memref<16x128xf32, #tpu.memory_space<vmem>>, vector<16x128xf32>
    %c0_1 = arith.constant 0 : index
    %c0_2 = arith.constant 0 : index
    %1 = vector.load %arg2[%c0_1, %c0_2] : memref<16x128xf32, #tpu.memory_space<vmem>>, vector<16x128xf32>
    %2 = arith.addf %0, %1 : vector<16x128xf32>
    %c0_3 = arith.constant 0 : index
    %c0_4 = arith.constant 0 : index
    %3 = vector.load %arg3[%c0_3, %c0_4] : memref<16x128xf32, #tpu.memory_space<vmem>>, vector<16x128xf32>
    tpu.vector_store %arg3[%c0_3, %c0_4], %2 {strides = array<i32>} : memref<16x128xf32, #tpu.memory_space<vmem>>, vector<16x128xf32>,
    return
  }
  func.func @transform_0(%arg0: i32) -> (i32, i32) {
    %c0_i32 = arith.constant 0 : i32
    %c0_i32_0 = arith.constant 0 : i32
    return %arg0, %c0_i32 : i32, i32
  }
  func.func @transform_1(%arg0: i32) -> (i32, i32) {
    %c0_i32 = arith.constant 0 : i32
    %c0_i32_0 = arith.constant 0 : i32
    return %arg0, %c0_i32 : i32, i32
  }
  func.func @transform_2(%arg0: i32) -> (i32, i32) {
    %c0_i32 = arith.constant 0 : i32
    %c0_i32_0 = arith.constant 0 : i32
    return %arg0, %c0_i32 : i32, i32
  }
}

</mosaic_0001>

<bundles_post_ra>
// kernel: tpu_custom_call.1
= control target key start
LH: loop header
LB: loop body
LE: loop exit
PB: predicated region body
PF: predicated region fallthrough
CT: control target
= control target key end

     0   :  { %7 = vsyncpa [#allocation3], 0  ;;  %s208_s0 = inlined_call_operand.hbm [shape: f32[16,128], index: 0, kind: input, shape index: {}]   ;;  %s209_s1 = inlined_call_operand.hbm [shape: f32[16,128], index: 1, kind: input, shape index: {}]   ;;  %s210_s2 = inlined_call_operand.hbm [shape: f32[16,128], index: 2, kind: output, shape index: {}]  }
   0x1   :  { %8 = vsyncpa [#allocation6], 0 }
   0x2   :  { %9 = vsyncpa [#allocation4], 0  ;;  %s143_s9 = smov [#allocation2]   ;;  %s71_s13 = scalar_lea.hbm %s208_s0, 256 }
   0x3   :  { %s15_s10 = sshll.u32 %s143_s9, 4  ;;  %p72_p0 = scmp.ne.s32.totalorder %s208_s0, %s71_s13  ;;  %s16_s10 = int_to_ptr.vmem [resolvable:$true] %s15_s10 }
   0x4   :  { %p75_p1 = scmp.lt.u32.totalorder %s71_s13, %s208_s0 }
   0x6   :  { %p77_p2 = pnand %p75_p1, %p72_p0 }
   0x8   :  { %80 = shalt.err (!%p77_p2)
}
   0x9   :  { %s81_s18 = scalar_lea.vmem %s16_s10, 256  ;;  %p86_p4 = scmp.lt.s32.totalorder %s16_s10, %s16_s10 }
   0xa   :  { %p82_p3 = scmp.ne.s32.totalorder %s16_s10, %s81_s18  ;;  %p87_p5 = scmp.lt.s32.totalorder %s81_s18, %s81_s18 }
   0xc   :  { %p88_p6 = por %p87_p5, %p86_p4 }
   0xe   :  { %p89_p7 = pnand %p88_p6, %p82_p3 }
  0x10   :  { %92 = shalt.err (!%p89_p7)
}
  0x11   :  { %s144_s19 = smov 128   ;;  %s145_s20 = smov 8  }
  0x12   :  { %21 = dma.hbm_to_vmem [thread:$0]  %s208_s0, 256, %s16_s10, [#allocation3], %s144_s19, %s144_s19, %s145_s20  }
  0x13   :  { %s146_s23 = smov [#allocation5]   ;;  %s93_s27 = scalar_lea.hbm %s209_s1, 256 }
  0x14   :  { %s27_s24 = sshll.u32 %s146_s23, 4  ;;  %p94_p8 = scmp.ne.s32.totalorder %s209_s1, %s93_s27  ;;  %s28_s24 = int_to_ptr.vmem [resolvable:$true] %s27_s24 }
  0x15   :  { %p97_p9 = scmp.lt.u32.totalorder %s93_s27, %s209_s1 }
  0x17   :  { %p99_p10 = pnand %p97_p9, %p94_p8 }
  0x19   :  { %102 = shalt.err (!%p99_p10)
}
  0x1a   :  { %s103_s4 = scalar_lea.vmem %s28_s24, 256  ;;  %p108_p12 = scmp.lt.s32.totalorder %s28_s24, %s28_s24 }
  0x1b   :  { %p104_p11 = scmp.ne.s32.totalorder %s28_s24, %s103_s4  ;;  %p109_p13 = scmp.lt.s32.totalorder %s103_s4, %s103_s4 }
  0x1d   :  { %p110_p0 = por %p109_p13, %p108_p12 }
  0x1f   :  { %p111_p1 = pnand %p110_p0, %p104_p11 }
  0x21   :  { %114 = shalt.err (!%p111_p1)
}
  0x22   :  { %33 = dma.hbm_to_vmem [thread:$0]  %s209_s1, 256, %s28_s24, [#allocation6], %s144_s19, %s144_s19, %s145_s20  }
  0x23   :  { %137 = dma.done.wait [#allocation3], 256  }
  0x24   :  { %138 = vsyncadd [#allocation3], 4294967040 }
  0x25   :  { %139 = dma.done.wait [#allocation6], 256  }
  0x26   :  { %140 = vsyncadd [#allocation6], 4294967040  ;;  %s147_s6 = smov [#allocation7]   ;;  %v40_v0 = vld [vmem:[#allocation2] sm:$0xff]  ;;  %v42_v1 = vld [vmem:[#allocation5] sm:$0xff] }
  0x27   :  { %s53_s7 = sshll.u32 %s147_s6, 4  ;;  %v41_v2 = vld [vmem:[#allocation2 + $0x8] sm:$0xff]  ;;  %v44_v3 = vadd.f32 %v42_v1, %v40_v0  ;;  %v43_v4 = vld [vmem:[#allocation5 + $0x8] sm:$0xff]  ;;  %s54_s7 = int_to_ptr.vmem [resolvable:$true] %s53_s7 }
  0x28   :  { %v45_v5 = vadd.f32 %v43_v4, %v41_v2  ;;  %s115_s8 = scalar_lea.vmem %s54_s7, 256  ;;  %p120_p3 = scmp.lt.s32.totalorder %s54_s7, %s54_s7 }
  0x29   :  { %46 = vst [vmem:[#allocation7] sm:$0xff] %v44_v3  ;;  %p116_p2 = scmp.ne.s32.totalorder %s54_s7, %s115_s8  ;;  %p121_p4 = scmp.lt.s32.totalorder %s115_s8, %s115_s8 }
  0x2a   :  { %47 = vst [vmem:[#allocation7 + $0x8] sm:$0xff] %v45_v5 }
  0x2b   :  { %p122_p5 = por %p121_p4, %p120_p3 }
  0x2d   :  { %p123_p6 = pnand %p122_p5, %p116_p2 }
  0x2f   :  { %126 = shalt.err (!%p123_p6)
}
  0x30   :  { %s127_s10 = scalar_lea.hbm %s210_s2, 256 }
  0x31   :  { %p128_p7 = scmp.ne.s32.totalorder %s210_s2, %s127_s10  ;;  %p131_p8 = scmp.lt.u32.totalorder %s127_s10, %s210_s2 }
  0x33   :  { %p133_p9 = pnand %p131_p8, %p128_p7 }
  0x35   :  { %136 = shalt.err (!%p133_p9)
}
  0x36   :  { %59 = dma.vmem_to_hbm [thread:$0]  %s54_s7, 256, %s210_s2, [#allocation4], %s144_s19, %s144_s19, %s145_s20  }
  0x37   :  { %141 = dma.done.wait [#allocation4], 256  }
  0x38   :  { %142 = vsyncadd [#allocation4], 4294967040 }
  0x39   :  { %63 = vsyncpa [#allocation3], 1 }
  0x3a   :  { %64 = vsyncpa [#allocation6], 1 }
  0x3b   :  { %65 = vsyncpa [#allocation4], 1 }

</bundles_post_ra>
